<compile_context>
chip_gen: v7x
topology: tpu7x:2x2x1
jax: 0.10.0
libtpu: 0.0.40
codegen_flags: <defaults>
</compile_context>

<pallas_src>
import functools

import jax
import jax.numpy as jnp
from jax.experimental import pallas as pl
from jax.experimental.pallas import tpu as pltpu


def _round_up(x, m):
    return ((x + m - 1) // m) * m


def _stat_pool_kernel(x_ref, o_ref, sum_ref, sumsq_ref, *,
                      seq_len, feat_dim, mask_l):
    """Grid: (batch_blocks, L_blocks).  L axis is the reduction axis (last)."""
    l = pl.program_id(1)
    nl = pl.num_programs(1)

    @pl.when(l == 0)
    def _init():
        sum_ref[...] = jnp.zeros_like(sum_ref)
        sumsq_ref[...] = jnp.zeros_like(sumsq_ref)

    # (TB, TL, D) chunk; widen to f32 per chunk only (keeps DMA in native dtype).
    x = x_ref[...].astype(jnp.float32)

    if mask_l:
        tl = x.shape[1]
        row = l * tl + jax.lax.broadcasted_iota(jnp.int32, x.shape, 1)
        x = jnp.where(row < seq_len, x, 0.0)

    sum_ref[...] += jnp.sum(x, axis=1)          # (TB, D)
    sumsq_ref[...] += jnp.sum(x * x, axis=1)    # (TB, D)

    @pl.when(l == nl - 1)
    def _finalize():
        inv_len = jnp.float32(1.0 / seq_len)
        mean = sum_ref[...] * inv_len
        var = sumsq_ref[...] * inv_len - mean * mean
        var = jnp.maximum(var, 0.0)             # guard against cancellation
        std = jnp.sqrt(var + 1e-12)
        o_ref[:, :feat_dim] = mean.astype(o_ref.dtype)
        o_ref[:, feat_dim:] = std.astype(o_ref.dtype)


def statistic_pooling(x, input_dim, *, tb=None, tl=None):
    """x: array reshapeable to [B, L, input_dim]. Returns [B, 2*input_dim]."""
    x_shape = x.shape
    if x.ndim != 3:
        x = x.reshape(x_shape[0], x_shape[-2], -1)
    assert x.shape[-1] == input_dim
    B, L, D = x.shape
    itemsize = jnp.dtype(x.dtype).itemsize

    # Batch block: >= 8 rows when possible (sublane-dense output stores);
    # otherwise the full (small) batch so the output block equals the array dim.
    if tb is None:
        tb = 8 if B >= 8 else B

    # L block: aim for ~2 MiB input tiles (double-buffered => ~4 MiB of VMEM),
    # rounded to a multiple of 8 sublanes, capped at round_up(L, 8).
    if tl is None:
        target_bytes = 2 * 1024 * 1024
        tl = max(8, target_bytes // max(1, tb * D * itemsize))
        tl = min(tl, _round_up(L, 8))
        tl = _round_up(tl, 8)

    nb = pl.cdiv(B, tb)
    nl = pl.cdiv(L, tl)
    mask_l = (L % tl) != 0   # only pay the mask/select when padding exists

    kernel = functools.partial(
        _stat_pool_kernel, seq_len=L, feat_dim=D, mask_l=mask_l)

    cost = pl.CostEstimate(
        flops=3 * B * L * D,                 # sum, square, sum-of-squares
        transcendentals=B * D,               # sqrt per output feature
        bytes_accessed=B * L * D * itemsize + B * 2 * D * itemsize,
    )

    return pl.pallas_call(
        kernel,
        out_shape=jax.ShapeDtypeStruct((B, 2 * D), x.dtype),
        grid_spec=pltpu.PrefetchScalarGridSpec(
            num_scalar_prefetch=0,
            grid=(nb, nl),
            in_specs=[pl.BlockSpec((tb, tl, D), lambda b, l: (b, l, 0))],
            out_specs=pl.BlockSpec((tb, 2 * D), lambda b, l: (b, 0)),
            scratch_shapes=[pltpu.VMEM((tb, D), jnp.float32),   # running sum
                            pltpu.VMEM((tb, D), jnp.float32)],  # running sumsq
        ),
        compiler_params=pltpu.CompilerParams(
            dimension_semantics=("parallel", "arbitrary"),
            vmem_limit_bytes=32 * 1024 * 1024,
        ),
        cost_estimate=cost,
    )(x)


def _reference(x, input_dim):
    x_shape = x.shape
    if x.ndim != 3:
        x = x.reshape(x_shape[0], x_shape[-2], -1)
    mean_x = jnp.mean(x, axis=1)
    var_x = jnp.mean((x - mean_x[:, None, :]) ** 2, axis=1)
    std_x = jnp.sqrt(var_x + 1e-12)
    return jnp.concatenate([mean_x, std_x], axis=1)


if __name__ == "__main__":
    key = jax.random.PRNGKey(0)

    # Test 1: basic small config (B=2, L=8, D=32).
    B, L, D = 2, 8, 32
    x = jax.random.normal(key, (B, L, D), dtype=jnp.float32)
    out = jax.block_until_ready(statistic_pooling(x, input_dim=D))
    ref = _reference(x, D)
    assert out.shape == (B, 2 * D), out.shape
    assert jnp.allclose(out, ref, atol=1e-5, rtol=1e-5), (
        f"max abs err {jnp.max(jnp.abs(out - ref))}")

    # Test 2: remainder blocks on both axes (B=9 with TB=8, L=20 with TL=8).
    key2 = jax.random.PRNGKey(0)
    B2, L2, D2 = 9, 20, 32
    x2 = jax.random.normal(key2, (B2, L2, D2), dtype=jnp.float32)
    out2 = jax.block_until_ready(
        statistic_pooling(x2, input_dim=D2, tb=8, tl=8))
    ref2 = _reference(x2, D2)
    assert out2.shape == (B2, 2 * D2), out2.shape
    assert jnp.allclose(out2, ref2, atol=1e-5, rtol=1e-5), (
        f"max abs err {jnp.max(jnp.abs(out2 - ref2))}")

    print("KERNEL_OK")
</pallas_src>

<mosaic_0001>
module attributes {stable_mosaic.version = 11 : i64} {
  func.func @_stat_pool_kernel(%arg0: i32, %arg1: i32, %arg2: memref<2x8x32xf32, #tpu.memory_space<vmem>>, %arg3: memref<2x64xf32, #tpu.memory_space<vmem>>, %arg4: memref<2x32xf32, #tpu.memory_space<vmem>>, %arg5: memref<2x32xf32, #tpu.memory_space<vmem>>) attributes {dimension_semantics = [#tpu.dimension_semantics<parallel>, #tpu.dimension_semantics<arbitrary>], iteration_bounds = array<i64: 1, 1>, scalar_prefetch = 0 : i64, scratch_operands = 2 : i64, tpu.core_type = #tpu.core_type<tc>, window_params = [{transform_indices = @transform_0, window_bounds = array<i64: 2, 8, 32>}, {transform_indices = @transform_1, window_bounds = array<i64: 2, 64>}]} {
    %c0_i32 = arith.constant 0 : i32
    %0 = arith.cmpi eq, %arg1, %c0_i32 : i32
    %1 = arith.extui %0 : i1 to i32
    %c0_i32_0 = arith.constant 0 : i32
    %2 = arith.cmpi ne, %1, %c0_i32_0 : i32
    scf.if %2 {
      %cst_14 = arith.constant 0.000000e+00 : f32
      %16 = vector.broadcast %cst_14 : f32 to vector<2x32xf32>
      %c0_15 = arith.constant 0 : index
      %c0_16 = arith.constant 0 : index
      %17 = vector.load %arg4[%c0_15, %c0_16] : memref<2x32xf32, #tpu.memory_space<vmem>>, vector<2x32xf32>
      tpu.vector_store %arg4[%c0_15, %c0_16], %16 {strides = array<i32>} : memref<2x32xf32, #tpu.memory_space<vmem>>, vector<2x32xf32>,
      %cst_17 = arith.constant 0.000000e+00 : f32
      %18 = vector.broadcast %cst_17 : f32 to vector<2x32xf32>
      %c0_18 = arith.constant 0 : index
      %c0_19 = arith.constant 0 : index
      %19 = vector.load %arg5[%c0_18, %c0_19] : memref<2x32xf32, #tpu.memory_space<vmem>>, vector<2x32xf32>
      tpu.vector_store %arg5[%c0_18, %c0_19], %18 {strides = array<i32>} : memref<2x32xf32, #tpu.memory_space<vmem>>, vector<2x32xf32>,
    } else {
    }
    %c0 = arith.constant 0 : index
    %c0_1 = arith.constant 0 : index
    %c0_2 = arith.constant 0 : index
    %3 = vector.load %arg2[%c0, %c0_1, %c0_2] : memref<2x8x32xf32, #tpu.memory_space<vmem>>, vector<2x8x32xf32>
    %c0_3 = arith.constant 0 : index
    %c0_4 = arith.constant 0 : index
    %4 = vector.load %arg4[%c0_3, %c0_4] : memref<2x32xf32, #tpu.memory_space<vmem>>, vector<2x32xf32>
    %cst = arith.constant dense<0.000000e+00> : vector<2x32xf32>
    %5 = vector.multi_reduction <add>, %3, %cst [1] : vector<2x8x32xf32> to vector<2x32xf32>
    %6 = arith.addf %4, %5 : vector<2x32xf32>
    %c0_5 = arith.constant 0 : index
    %c0_6 = arith.constant 0 : index
    %7 = vector.load %arg4[%c0_5, %c0_6] : memref<2x32xf32, #tpu.memory_space<vmem>>, vector<2x32xf32>
    tpu.vector_store %arg4[%c0_5, %c0_6], %6 {strides = array<i32>} : memref<2x32xf32, #tpu.memory_space<vmem>>, vector<2x32xf32>,
    %c0_7 = arith.constant 0 : index
    %c0_8 = arith.constant 0 : index
    %8 = vector.load %arg5[%c0_7, %c0_8] : memref<2x32xf32, #tpu.memory_space<vmem>>, vector<2x32xf32>
    %9 = arith.mulf %3, %3 : vector<2x8x32xf32>
    %cst_9 = arith.constant dense<0.000000e+00> : vector<2x32xf32>
    %10 = vector.multi_reduction <add>, %9, %cst_9 [1] : vector<2x8x32xf32> to vector<2x32xf32>
    %11 = arith.addf %8, %10 : vector<2x32xf32>
    %c0_10 = arith.constant 0 : index
    %c0_11 = arith.constant 0 : index
    %12 = vector.load %arg5[%c0_10, %c0_11] : memref<2x32xf32, #tpu.memory_space<vmem>>, vector<2x32xf32>
    tpu.vector_store %arg5[%c0_10, %c0_11], %11 {strides = array<i32>} : memref<2x32xf32, #tpu.memory_space<vmem>>, vector<2x32xf32>,
    %c0_i32_12 = arith.constant 0 : i32
    %13 = arith.cmpi eq, %arg1, %c0_i32_12 : i32
    %14 = arith.extui %13 : i1 to i32
    %c0_i32_13 = arith.constant 0 : i32
    %15 = arith.cmpi ne, %14, %c0_i32_13 : i32
    scf.if %15 {
      %c0_14 = arith.constant 0 : index
      %c0_15 = arith.constant 0 : index
      %16 = vector.load %arg4[%c0_14, %c0_15] : memref<2x32xf32, #tpu.memory_space<vmem>>, vector<2x32xf32>
      %cst_16 = arith.constant 1.250000e-01 : f32
      %17 = vector.broadcast %cst_16 : f32 to vector<2x32xf32>
      %18 = arith.mulf %16, %17 : vector<2x32xf32>
      %c0_17 = arith.constant 0 : index
      %c0_18 = arith.constant 0 : index
      %19 = vector.load %arg5[%c0_17, %c0_18] : memref<2x32xf32, #tpu.memory_space<vmem>>, vector<2x32xf32>
      %cst_19 = arith.constant 1.250000e-01 : f32
      %20 = vector.broadcast %cst_19 : f32 to vector<2x32xf32>
      %21 = arith.mulf %19, %20 : vector<2x32xf32>
      %22 = arith.mulf %18, %18 : vector<2x32xf32>
      %23 = arith.subf %21, %22 : vector<2x32xf32>
      %cst_20 = arith.constant 0.000000e+00 : f32
      %24 = vector.broadcast %cst_20 : f32 to vector<2x32xf32>
      %25 = arith.maximumf %23, %24 : vector<2x32xf32>
      %cst_21 = arith.constant 9.99999996E-13 : f32
      %26 = vector.broadcast %cst_21 : f32 to vector<2x32xf32>
      %27 = arith.addf %25, %26 : vector<2x32xf32>
      %28 = math.sqrt %27 : vector<2x32xf32>
      %c0_22 = arith.constant 0 : index
      %c0_23 = arith.constant 0 : index
      %29 = vector.load %arg3[%c0_22, %c0_23] : memref<2x64xf32, #tpu.memory_space<vmem>>, vector<2x32xf32>
      tpu.vector_store %arg3[%c0_22, %c0_23], %18 {strides = array<i32>} : memref<2x64xf32, #tpu.memory_space<vmem>>, vector<2x32xf32>,
      %c0_24 = arith.constant 0 : index
      %c32 = arith.constant 32 : index
      %30 = vector.load %arg3[%c0_24, %c32] : memref<2x64xf32, #tpu.memory_space<vmem>>, vector<2x32xf32>
      tpu.vector_store %arg3[%c0_24, %c32], %28 {strides = array<i32>} : memref<2x64xf32, #tpu.memory_space<vmem>>, vector<2x32xf32>,
    } else {
    }
    return
  }
  func.func @transform_0(%arg0: i32, %arg1: i32) -> (i32, i32, i32) {
    %c0_i32 = arith.constant 0 : i32
    %c0_i32_0 = arith.constant 0 : i32
    return %arg0, %arg1, %c0_i32 : i32, i32, i32
  }
  func.func @transform_1(%arg0: i32, %arg1: i32) -> (i32, i32) {
    %c0_i32 = arith.constant 0 : i32
    %c0_i32_0 = arith.constant 0 : i32
    return %arg0, %c0_i32 : i32, i32
  }
}

</mosaic_0001>

<bundles_post_ra>
// kernel: tpu_custom_call.1
= control target key start
LH: loop header
LB: loop body
LE: loop exit
PB: predicated region body
PF: predicated region fallthrough
CT: control target
= control target key end

     0   :  { %6 = vsyncpa [#allocation5], 0  ;;  %s220_s0 = inlined_call_operand.hbm [shape: f32[2,8,32], index: 0, kind: input, shape index: {}]   ;;  %s221_s1 = inlined_call_operand.hbm [shape: f32[2,64], index: 1, kind: output, shape index: {}]  }
   0x1   :  { %7 = vsyncpa [#allocation6], 0  ;;  %s175_s6 = smov [#allocation4]   ;;  %s127_s10 = scalar_lea.hbm %s220_s0, 256 }
   0x2   :  { %s13_s7 = sshll.u32 %s175_s6, 4  ;;  %p128_p0 = scmp.ne.s32.totalorder %s220_s0, %s127_s10  ;;  %s14_s7 = int_to_ptr.vmem [resolvable:$true] %s13_s7 }
   0x3   :  { %p131_p1 = scmp.lt.u32.totalorder %s127_s10, %s220_s0 }
   0x5   :  { %p133_p2 = pnand %p131_p1, %p128_p0 }
   0x7   :  { %136 = shalt.err (!%p133_p2)
}
   0x8   :  { %s137_s15 = scalar_lea.vmem %s14_s7, 256  ;;  %p142_p4 = scmp.lt.s32.totalorder %s14_s7, %s14_s7 }
   0x9   :  { %p138_p3 = scmp.ne.s32.totalorder %s14_s7, %s137_s15  ;;  %p143_p5 = scmp.lt.s32.totalorder %s137_s15, %s137_s15 }
   0xb   :  { %p144_p6 = por %p143_p5, %p142_p4 }
   0xd   :  { %p145_p7 = pnand %p144_p6, %p138_p3 }
   0xf   :  { %148 = shalt.err (!%p145_p7)
}
  0x10   :  { %s176_s16 = smov 128   ;;  %s177_s17 = smov 8  }
  0x11   :  { %19 = dma.hbm_to_vmem [thread:$0]  %s220_s0, 256, %s14_s7, [#allocation5], %s176_s16, %s176_s16, %s177_s17  }
  0x12   :  { %171 = dma.done.wait [#allocation5], 256  }
  0x13   :  { %172 = vsyncadd [#allocation5], 4294967040  ;;  %vm27_vm0 = vcmask 254976   ;;  %v178_v0 = vmov 0.0   ;;  %vm33_vm1 = vcmask 261120   ;;  %v30_v1 = vld [vmem:[#allocation4] sm:$0xff] }
  0x14   :  { %28 = vst.msk [vmem:[#allocation2] sm:$0x3] %vm27_vm0, %v178_v0  ;;  %29 = vst.msk [vmem:[#allocation3] sm:$0x3] %vm27_vm0, %v178_v0  ;;  %v31_v2 = vld [vmem:[#allocation4 + $0x8] sm:$0xff]  ;;  %v34_v3 = vsel %vm33_vm1, %v30_v1, 0.0  ;;  %v57_v5 = vmul.f32 %v30_v1, %v30_v1 }
  0x15   :  { %v41_v4 = vsel %vm33_vm1, %v31_v2, 0.0  ;;  %v58_v6 = vmul.f32 %v31_v2, %v31_v2  ;;  %v35_v7 = vrot.slane %v34_v3, 4  ;;  %vm50_vm2 = vcmask 1041409   ;;  %s179_s0 = smov 32   ;;  %s180_s20 = smov [#allocation7]  }
  0x16   :  { %v42_v8 = vrot.slane %v41_v4, 4  ;;  %v59_v9 = vsel %vm33_vm1, %v57_v5, 0.0  ;;  %s110_s21 = sshll.u32 %s180_s20, 4  ;;  %vm102_vm5 = vcmask 517376   ;;  %s111_s21 = int_to_ptr.vmem [resolvable:$true] %s110_s21 }
  0x17   :  { %v66_v10 = vsel %vm33_vm1, %v58_v6, 0.0  ;;  %v36_v11 = vadd.f32 %v35_v7, %v34_v3  ;;  %v60_v13 = vrot.slane %v59_v9, 4  ;;  %s149_s22 = scalar_lea.vmem %s111_s21, 32  ;;  %p154_p9 = scmp.lt.s32.totalorder %s111_s21, %s111_s21 }
  0x18   :  { %v43_v12 = vadd.f32 %v42_v8, %v41_v4  ;;  %v67_v14 = vrot.slane %v66_v10, 4  ;;  %p150_p8 = scmp.ne.s32.totalorder %s111_s21, %s149_s22  ;;  %p155_p10 = scmp.lt.s32.totalorder %s149_s22, %s149_s22 }
  0x19   :  { %v37_v15 = vrot.slane %v36_v11, 2  ;;  %v61_v17 = vadd.f32 %v60_v13, %v59_v9 }
  0x1a   :  { %v44_v16 = vrot.slane %v43_v12, 2  ;;  %v68_v18 = vadd.f32 %v67_v14, %v66_v10  ;;  %p156_p11 = por %p155_p10, %p154_p9 }
  0x1b   :  { %v38_v19 = vadd.f32 %v37_v15, %v36_v11  ;;  %v62_v21 = vrot.slane %v61_v17, 2  ;;  %v32_v27 = vld [vmem:[#allocation2] sm:$0x3]  ;;  %v56_v33 = vld [vmem:[#allocation3] sm:$0x3] }
  0x1c   :  { %v45_v20 = vadd.f32 %v44_v16, %v43_v12  ;;  %v69_v22 = vrot.slane %v68_v18, 2  ;;  %p157_p12 = pnand %p156_p11, %p150_p8 }
  0x1d   :  { %v39_v23 = vrot.slane %v38_v19, 1  ;;  %v63_v25 = vadd.f32 %v62_v21, %v61_v17 }
  0x1e   :  { %v46_v24 = vrot.slane %v45_v20, 1  ;;  %v70_v26 = vadd.f32 %v69_v22, %v68_v18 }
  0x1f   :  { %v40_v28 = vadd.f32 %v39_v23, %v38_v19  ;;  %v64_v30 = vrot.slane %v63_v25, 1 }
  0x20   :  { %v47_v29 = vadd.f32 %v46_v24, %v45_v20  ;;  %v71_v31 = vrot.slane %v70_v26, 1 }
  0x21   :  { %v65_v34 = vadd.f32 %v64_v30, %v63_v25 }
  0x22   :  { %v51_v32 = vsel %vm50_vm2, %v47_v29, %v40_v28  ;;  %v72_v35 = vadd.f32 %v71_v31, %v70_v26 }
  0x23   :  { %v53_v36 = vadd.f32 %v51_v32, %v32_v27 }
  0x24   :  { %v75_v37 = vsel %vm50_vm2, %v72_v35, %v65_v34 }
  0x25   :  { %55 = vst.msk [vmem:[#allocation2] sm:$0x3] %vm27_vm0, %v53_v36  ;;  %v77_v38 = vadd.f32 %v75_v37, %v56_v33 }
  0x27   :  { %78 = vst.msk [vmem:[#allocation3] sm:$0x3] %vm27_vm0, %v77_v38 }
  0x2c   :  { %v82_v39 = vld [vmem:[#allocation2] sm:$0x3] }
  0x2d   :  { %v83_v40 = vmul.f32 0.125, %v82_v39 }
  0x2e   :  { %v84_v41 = vld [vmem:[#allocation3] sm:$0x3] }
  0x2f   :  { %v85_v42 = vmul.f32 0.125, %v84_v41  ;;  %v86_v43 = vmul.f32 %v83_v40, %v83_v40  ;;  %97 = vst.msk [vmem:[#allocation7] sm:$0x3] %vm27_vm0, %v83_v40 }
  0x31   :  { %v87_v44 = vsub.f32 %v85_v42, %v86_v43 }
  0x33   :  { %v88_v45 = vmax.f32 %v87_v44, 0.0 }
  0x35   :  { %v89_v46 = vadd.f32 1e-12, %v88_v45 }
  0x37   :  { %125 = vrsqrt.f32 %v89_v46  ;;  %vm92_vm3 = vcmp.eq.f32.partialorder %v89_v46, inf  ;;  %v95_v48 = vand.u32 2147483648, %v89_v46  ;;  %vm94_vm4 = vcmp.eq.f32.partialorder %v89_v46, 0.0 }
  0x41   :  { %v126_v47 = vpop.eup %125 }
  0x42   :  { %v91_v49 = vmul.f32 %v126_v47, %v89_v46 }
  0x44   :  { %v93_v50 = vsel %vm92_vm3, %v89_v46, %v91_v49 }
  0x45   :  { %v96_v51 = vsel %vm94_vm4, %v95_v48, %v93_v50 }
  0x46   :  { %99 = vrot.lane.b32.xlu0 %v96_v51, %s179_s0 }
  0xb8   :  { %v100_v52 = vpop.permute.xlu0 %99 }
  0xb9   :  { %103 = vst.msk [vmem:[#allocation7] sm:$0x3] %vm102_vm5, %v100_v52 }
  0xba   :  { %160 = shalt.err (!%p157_p12)
}
  0xbb   :  { %s161_s25 = scalar_lea.hbm %s221_s1, 32 }
  0xbc   :  { %p162_p13 = scmp.ne.s32.totalorder %s221_s1, %s161_s25  ;;  %p165_p0 = scmp.lt.u32.totalorder %s161_s25, %s221_s1 }
  0xbe   :  { %p167_p1 = pnand %p165_p0, %p162_p13 }
  0xc0   :  { %170 = shalt.err (!%p167_p1)
}
  0xc1   :  { %113 = dma.vmem_to_hbm [thread:$0]  %s111_s21, 32, %s221_s1, [#allocation6]  }
  0xc2   :  { %173 = dma.done.wait [#allocation6], 32  }
  0xc3   :  { %174 = vsyncadd [#allocation6], 4294967264 }
  0xc4   :  { %117 = vsyncpa [#allocation5], 1 }
  0xc5   :  { %118 = vsyncpa [#allocation6], 1 }

</bundles_post_ra>
